<compile_context>
chip_gen: v7x
topology: tpu7x:2x2x1
jax: 0.10.0
libtpu: 0.0.40
codegen_flags: <defaults>
</compile_context>

<pallas_src>
import functools
import math

import jax
import jax.numpy as jnp
from jax import lax
from jax.experimental import pallas as pl
from jax.experimental.pallas import tpu as pltpu


def _round_up(n, m):
    return ((n + m - 1) // m) * m


# ---------------------------------------------------------------------------
# Fused style-MLP kernel: grid=(n_fc,), activation carried in VMEM scratch.
# ---------------------------------------------------------------------------
def _fused_mlp_kernel(x_ref, w_ref, b_ref, o_ref, h_ref):
    layer = pl.program_id(0)
    n_layers = pl.num_programs(0)

    @pl.when(layer == 0)
    def _load_input():
        h_ref[...] = x_ref[...].astype(jnp.float32)

    # h: (Mp, D) f32; w_ref[0]: (D, D) pre-scaled & pre-transposed (in, out).
    y = jnp.dot(h_ref[...], w_ref[0].astype(jnp.float32),
                preferred_element_type=jnp.float32)
    y = y + b_ref[0].astype(jnp.float32)          # (1, D) bias broadcast

    @pl.when(layer < n_layers - 1)
    def _hidden():
        h_ref[...] = jnp.where(y >= 0.0, y, 0.2 * y)   # LeakyReLU(0.2)

    @pl.when(layer == n_layers - 1)
    def _final():
        o_ref[...] = y.astype(o_ref.dtype)             # last layer: no actvn


def pack_style_mlp_params(weights, biases, dtype=jnp.float32):
    """One-time setup: fold in the EqualLR scale, transpose each weight to
    (in, out), zero-pad to a common lane-aligned width, stack per layer.

    weights[l]: (out_dim_l, in_dim_l)  (native PyTorch layout)
    biases[l]:  (out_dim_l,)
    Returns (n_fc, D, D) weight stack and (n_fc, 1, D) bias stack.
    """
    d = max(max(w.shape) for w in weights)
    D = _round_up(d, 128)
    w_stack, b_stack = [], []
    for w, b in zip(weights, biases):
        out_dim, in_dim = w.shape
        scale = math.sqrt(2.0 / in_dim)          # EqualLR: fan_in = in_dim
        wt = (w * scale).T                       # (in, out) — MXU-canonical
        wt = jnp.pad(wt, ((0, D - in_dim), (0, D - out_dim)))
        w_stack.append(wt.astype(dtype))
        b_stack.append(jnp.pad(b, (0, D - out_dim)).reshape(1, D).astype(dtype))
    return jnp.stack(w_stack), jnp.stack(b_stack)


def style_mlp_fused(style, w_stack, b_stack, out_dim):
    """StyledDecoder.mlp forward in a single pallas_call.

    style:   (B, style_dim)
    w_stack: (n_fc, D, D)  from pack_style_mlp_params (pre-scaled, (in, out))
    b_stack: (n_fc, 1, D)
    Returns (B, out_dim).
    """
    n_fc, D, _ = w_stack.shape
    B, in_dim = style.shape
    Mp = _round_up(B, 8)
    xp = jnp.pad(style, ((0, Mp - B), (0, D - in_dim)))

    itemsize = jnp.dtype(w_stack.dtype).itemsize
    out = pl.pallas_call(
        _fused_mlp_kernel,
        out_shape=jax.ShapeDtypeStruct((Mp, D), style.dtype),
        grid_spec=pltpu.PrefetchScalarGridSpec(
            num_scalar_prefetch=0,
            grid=(n_fc,),
            in_specs=[
                pl.BlockSpec((Mp, D), lambda l: (0, 0)),        # padded style
                pl.BlockSpec((1, D, D), lambda l: (l, 0, 0)),   # layer-l weight
                pl.BlockSpec((1, 1, D), lambda l: (l, 0, 0)),   # layer-l bias
            ],
            out_specs=pl.BlockSpec((Mp, D), lambda l: (0, 0)),
            scratch_shapes=[pltpu.VMEM((Mp, D), jnp.float32)],  # carried act.
        ),
        # Sequential dependency through the carried activation -> arbitrary.
        compiler_params=pltpu.CompilerParams(
            dimension_semantics=("arbitrary",)),
        cost_estimate=pl.CostEstimate(
            flops=2 * n_fc * Mp * D * D,
            transcendentals=0,
            bytes_accessed=int(w_stack.size + b_stack.size + xp.size
                               + Mp * D) * itemsize),
    )(xp, w_stack, b_stack)

    return out[:B, :out_dim]


# ---------------------------------------------------------------------------
# Standalone tiled EqualLinear kernel (general / large-shape path).
# ---------------------------------------------------------------------------
def _equal_linear_kernel(x_ref, w_ref, b_ref, o_ref, acc_ref, *, scale,
                         activation):
    k = pl.program_id(2)

    @pl.when(k == 0)
    def _init():
        acc_ref[...] = jnp.zeros_like(acc_ref)

    # x_ref: (tm, tk), w_ref: (tk, tn) — weight was transposed once at setup,
    # so this is the canonical contraction (no per-step XLU transpose).
    acc_ref[...] += jnp.dot(x_ref[...], w_ref[...],
                            preferred_element_type=jnp.float32)

    @pl.when(k == pl.num_programs(2) - 1)
    def _finalize():
        # EqualLR scale on the small accumulator, fused with bias + LeakyReLU.
        y = acc_ref[...] * scale + b_ref[...].astype(jnp.float32)
        if activation == "lrelu":
            y = jnp.where(y >= 0.0, y, 0.2 * y)
        o_ref[...] = y.astype(o_ref.dtype)


def equal_linear(x, weight_orig, bias, *, activation="none",
                 tm=256, tn=256, tk=512):
    """Equalized-LR linear: y = x @ (weight_orig * sqrt(2/in_dim)).T + bias.

    x:           (B, in_dim)
    weight_orig: (out_dim, in_dim)   -- native PyTorch layout
    bias:        (out_dim,)
    activation:  "none" | "lrelu"  (LeakyReLU(0.2) fused into the epilogue)
    """
    M, K = x.shape
    N, K2 = weight_orig.shape
    assert K == K2, (K, K2)
    scale = math.sqrt(2.0 / K)  # fan_in = in_dim (trace-time constant)

    tm = min(tm, _round_up(M, 8))
    tn = min(tn, _round_up(N, 128))
    tk = min(tk, _round_up(K, 128))
    Mp, Np, Kp = _round_up(M, tm), _round_up(N, tn), _round_up(K, tk)

    xp = x if (Mp == M and Kp == K) else jnp.pad(x, ((0, Mp - M), (0, Kp - K)))
    wt = weight_orig.T                                # one-time (K, N) layout
    wp = wt if (Np == N and Kp == K) else jnp.pad(wt, ((0, Kp - K), (0, Np - N)))
    bp = (bias if Np == N else jnp.pad(bias, (0, Np - N))).reshape(1, Np)

    kernel = functools.partial(_equal_linear_kernel, scale=scale,
                               activation=activation)
    itemsize = jnp.dtype(x.dtype).itemsize

    out = pl.pallas_call(
        kernel,
        out_shape=jax.ShapeDtypeStruct((Mp, Np), x.dtype),
        grid_spec=pltpu.PrefetchScalarGridSpec(
            num_scalar_prefetch=0,
            grid=(Mp // tm, Np // tn, Kp // tk),
            in_specs=[
                pl.BlockSpec((tm, tk), lambda i, j, k: (i, k)),   # x
                pl.BlockSpec((tk, tn), lambda i, j, k: (k, j)),   # weight (K,N)
                pl.BlockSpec((1, tn), lambda i, j, k: (0, j)),    # bias
            ],
            out_specs=pl.BlockSpec((tm, tn), lambda i, j, k: (i, j)),
            scratch_shapes=[pltpu.VMEM((tm, tn), jnp.float32)],
        ),
        compiler_params=pltpu.CompilerParams(
            dimension_semantics=("parallel", "parallel", "arbitrary")),
        cost_estimate=pl.CostEstimate(
            flops=2 * Mp * Np * Kp,
            transcendentals=0,
            bytes_accessed=int(xp.size + wp.size + bp.size + Mp * Np) * itemsize),
    )(xp, wp, bp)

    return out[:M, :N] if (Mp != M or Np != N) else out


# ---------------------------------------------------------------------------
# Pure-JAX references
# ---------------------------------------------------------------------------
def equal_linear_ref(x, weight_orig, bias):
    s = math.sqrt(2.0 / x.shape[1])
    return jnp.dot(x, (weight_orig * s).T,
                   precision=lax.Precision.HIGHEST) + bias


def style_mlp_ref(style, weights, biases):
    h = style
    n = len(weights)
    for li, (w, b) in enumerate(zip(weights, biases)):
        h = equal_linear_ref(h, w, b)
        if li < n - 1:
            h = jnp.where(h >= 0.0, h, 0.2 * h)
    return h


# ---------------------------------------------------------------------------
# Test
# ---------------------------------------------------------------------------
if __name__ == "__main__":
    key = jax.random.PRNGKey(0)

    # --- single EqualLinear at small, unaligned sizes (exercises padding) ---
    key, k_x, k_w = jax.random.split(key, 3)
    batch, in_dim, out_dim = 8, 32, 16
    x = jax.random.normal(k_x, (batch, in_dim), dtype=jnp.float32)
    weight_orig = jax.random.normal(k_w, (out_dim, in_dim), dtype=jnp.float32)
    bias = jnp.zeros((out_dim,), dtype=jnp.float32)

    out = jax.block_until_ready(equal_linear(x, weight_orig, bias))
    ref = equal_linear_ref(x, weight_orig, bias)
    assert out.shape == (batch, out_dim)
    assert jnp.allclose(out, ref, atol=2e-5, rtol=2e-5), \
        float(jnp.max(jnp.abs(out - ref)))

    # --- StyledDecoder style-mapping MLP, fused into one pallas_call --------
    # style_dim=50 -> fc_dim=256 x7 -> latent_dim=256, n_fc=8, batch=2
    style_dim, fc_dim, latent_dim, n_fc, bsz = 50, 256, 256, 8, 2
    dims = [style_dim] + [fc_dim] * (n_fc - 1) + [latent_dim]
    weights, biases = [], []
    for li in range(n_fc):
        key, k_w = jax.random.split(key)
        weights.append(
            jax.random.normal(k_w, (dims[li + 1], dims[li]), dtype=jnp.float32))
        biases.append(jnp.zeros((dims[li + 1],), dtype=jnp.float32))

    key, k_s = jax.random.split(key)
    style = jax.random.normal(k_s, (bsz, style_dim), dtype=jnp.float32)

    # one-time setup: pad / scale / transpose / stack the MLP parameters
    w_stack, b_stack = pack_style_mlp_params(weights, biases)

    latent = jax.block_until_ready(
        style_mlp_fused(style, w_stack, b_stack, latent_dim))
    latent_ref = style_mlp_ref(style, weights, biases)
    assert latent.shape == (bsz, latent_dim)
    assert jnp.allclose(latent, latent_ref, atol=2e-3, rtol=2e-3), \
        float(jnp.max(jnp.abs(latent - latent_ref)))

    print("KERNEL_OK")
</pallas_src>

<mosaic_0001>
module attributes {stable_mosaic.version = 11 : i64} {
  func.func @_equal_linear_kernel(%arg0: i32, %arg1: i32, %arg2: i32, %arg3: memref<8x128xf32, #tpu.memory_space<vmem>>, %arg4: memref<128x128xf32, #tpu.memory_space<vmem>>, %arg5: memref<1x128xf32, #tpu.memory_space<vmem>>, %arg6: memref<8x128xf32, #tpu.memory_space<vmem>>, %arg7: memref<8x128xf32, #tpu.memory_space<vmem>>) attributes {dimension_semantics = [#tpu.dimension_semantics<parallel>, #tpu.dimension_semantics<parallel>, #tpu.dimension_semantics<arbitrary>], iteration_bounds = array<i64: 1, 1, 1>, scalar_prefetch = 0 : i64, scratch_operands = 1 : i64, tpu.core_type = #tpu.core_type<tc>, window_params = [{transform_indices = @transform_0, window_bounds = array<i64: 8, 128>}, {transform_indices = @transform_1, window_bounds = array<i64: 128, 128>}, {transform_indices = @transform_2, window_bounds = array<i64: 1, 128>}, {transform_indices = @transform_3, window_bounds = array<i64: 8, 128>}]} {
    %c0_i32 = arith.constant 0 : i32
    %0 = arith.cmpi eq, %arg2, %c0_i32 : i32
    %1 = arith.extui %0 : i1 to i32
    %c0_i32_0 = arith.constant 0 : i32
    %2 = arith.cmpi ne, %1, %c0_i32_0 : i32
    scf.if %2 {
      %cst_10 = arith.constant 0.000000e+00 : f32
      %12 = vector.broadcast %cst_10 : f32 to vector<8x128xf32>
      %c0_11 = arith.constant 0 : index
      %c0_12 = arith.constant 0 : index
      %13 = vector.load %arg7[%c0_11, %c0_12] : memref<8x128xf32, #tpu.memory_space<vmem>>, vector<8x128xf32>
      tpu.vector_store %arg7[%c0_11, %c0_12], %12 {strides = array<i32>} : memref<8x128xf32, #tpu.memory_space<vmem>>, vector<8x128xf32>,
    } else {
    }
    %c0 = arith.constant 0 : index
    %c0_1 = arith.constant 0 : index
    %3 = vector.load %arg7[%c0, %c0_1] : memref<8x128xf32, #tpu.memory_space<vmem>>, vector<8x128xf32>
    %c0_2 = arith.constant 0 : index
    %c0_3 = arith.constant 0 : index
    %4 = vector.load %arg3[%c0_2, %c0_3] : memref<8x128xf32, #tpu.memory_space<vmem>>, vector<8x128xf32>
    %c0_4 = arith.constant 0 : index
    %c0_5 = arith.constant 0 : index
    %5 = vector.load %arg4[%c0_4, %c0_5] : memref<128x128xf32, #tpu.memory_space<vmem>>, vector<128x128xf32>
    %cst = arith.constant dense<0.000000e+00> : vector<8x128xf32>
    %6 = tpu.matmul %4, %5, %cst {dimension_numbers = #tpu.dot_dimension_numbers<[1], [0], [0], [1], [0, 0, 1, 1], [], []>} : vector<8x128xf32>, vector<128x128xf32>, vector<8x128xf32> -> vector<8x128xf32>
    %7 = arith.addf %3, %6 : vector<8x128xf32>
    %c0_6 = arith.constant 0 : index
    %c0_7 = arith.constant 0 : index
    %8 = vector.load %arg7[%c0_6, %c0_7] : memref<8x128xf32, #tpu.memory_space<vmem>>, vector<8x128xf32>
    tpu.vector_store %arg7[%c0_6, %c0_7], %7 {strides = array<i32>} : memref<8x128xf32, #tpu.memory_space<vmem>>, vector<8x128xf32>,
    %c0_i32_8 = arith.constant 0 : i32
    %9 = arith.cmpi eq, %arg2, %c0_i32_8 : i32
    %10 = arith.extui %9 : i1 to i32
    %c0_i32_9 = arith.constant 0 : i32
    %11 = arith.cmpi ne, %10, %c0_i32_9 : i32
    scf.if %11 {
      %c0_10 = arith.constant 0 : index
      %c0_11 = arith.constant 0 : index
      %12 = vector.load %arg7[%c0_10, %c0_11] : memref<8x128xf32, #tpu.memory_space<vmem>>, vector<8x128xf32>
      %cst_12 = arith.constant 2.500000e-01 : f32
      %13 = vector.broadcast %cst_12 : f32 to vector<8x128xf32>
      %14 = arith.mulf %12, %13 : vector<8x128xf32>
      %c0_13 = arith.constant 0 : index
      %c0_14 = arith.constant 0 : index
      %15 = vector.load %arg5[%c0_13, %c0_14] : memref<1x128xf32, #tpu.memory_space<vmem>>, vector<1x128xf32>
      %16 = vector.broadcast %15 : vector<1x128xf32> to vector<8x128xf32>
      %17 = arith.addf %14, %16 : vector<8x128xf32>
      %c0_15 = arith.constant 0 : index
      %c0_16 = arith.constant 0 : index
      %18 = vector.load %arg6[%c0_15, %c0_16] : memref<8x128xf32, #tpu.memory_space<vmem>>, vector<8x128xf32>
      tpu.vector_store %arg6[%c0_15, %c0_16], %17 {strides = array<i32>} : memref<8x128xf32, #tpu.memory_space<vmem>>, vector<8x128xf32>,
    } else {
    }
    return
  }
  func.func @transform_0(%arg0: i32, %arg1: i32, %arg2: i32) -> (i32, i32) {
    %c0_i32 = arith.constant 0 : i32
    return %arg0, %arg2 : i32, i32
  }
  func.func @transform_1(%arg0: i32, %arg1: i32, %arg2: i32) -> (i32, i32) {
    %c0_i32 = arith.constant 0 : i32
    return %arg2, %arg1 : i32, i32
  }
  func.func @transform_2(%arg0: i32, %arg1: i32, %arg2: i32) -> (i32, i32) {
    %c0_i32 = arith.constant 0 : i32
    %c0_i32_0 = arith.constant 0 : i32
    return %c0_i32, %arg1 : i32, i32
  }
  func.func @transform_3(%arg0: i32, %arg1: i32, %arg2: i32) -> (i32, i32) {
    %c0_i32 = arith.constant 0 : i32
    return %arg0, %arg1 : i32, i32
  }
}

</mosaic_0001>

<bundles_post_ra>
// kernel: tpu_custom_call.1
= control target key start
LH: loop header
LB: loop body
LE: loop exit
PB: predicated region body
PF: predicated region fallthrough
CT: control target
= control target key end

     0   :  { %8 = vsyncpa [#allocation4], 0  ;;  %s397_s0 = inlined_call_operand.hbm [shape: f32[8,128], index: 0, kind: input, shape index: {}]   ;;  %s398_s1 = inlined_call_operand.hbm [shape: f32[128,128], index: 1, kind: input, shape index: {}]   ;;  %s399_s2 = inlined_call_operand.vmem [shape: f32[1,128], index: 2, kind: input, shape index: {}]   ;;  %s400_s3 = inlined_call_operand.hbm [shape: f32[8,128], index: 3, kind: output, shape index: {}]  }
   0x1   :  { %9 = vsyncpa [#allocation7], 0 }
   0x2   :  { %10 = vsyncpa [#allocation5], 0  ;;  %s323_s12 = smov [#allocation3]   ;;  %s324_s14 = smov [#allocation6]  }
   0x3   :  { %s17_s13 = sshll.u32 %s323_s12, 4  ;;  %s26_s15 = sshll.u32 %s324_s14, 4  ;;  %s18_s13 = int_to_ptr.vmem [resolvable:$true] %s17_s13  ;;  %s351_s15 = int_to_ptr.vmem [resolvable:$true] %s26_s15 }
   0x4   :  { %s251_s18 = scalar_lea.hbm %s397_s0, 128 }
   0x5   :  { %p252_p0 = scmp.ne.s32.totalorder %s397_s0, %s251_s18  ;;  %p255_p1 = scmp.lt.u32.totalorder %s251_s18, %s397_s0 }
   0x7   :  { %p257_p2 = pnand %p255_p1, %p252_p0 }
   0x9   :  { %260 = shalt.err (!%p257_p2)
}
   0xa   :  { %s261_s23 = scalar_lea.vmem %s18_s13, 128  ;;  %p266_p4 = scmp.lt.s32.totalorder %s18_s13, %s18_s13 }
   0xb   :  { %p262_p3 = scmp.ne.s32.totalorder %s18_s13, %s261_s23  ;;  %p267_p5 = scmp.lt.s32.totalorder %s261_s23, %s261_s23 }
   0xd   :  { %p268_p6 = por %p267_p5, %p266_p4 }
   0xf   :  { %p269_p7 = pnand %p268_p6, %p262_p3 }
  0x11   :  { %272 = shalt.err (!%p269_p7)
}
  0x12   :  { %20 = dma.hbm_to_vmem [thread:$0]  %s397_s0, 128, %s18_s13, [#allocation4]  }
  0x13   :  { %s273_s28 = scalar_lea.hbm %s398_s1, 2048 }
  0x14   :  { %p274_p8 = scmp.ne.s32.totalorder %s398_s1, %s273_s28  ;;  %p277_p9 = scmp.lt.u32.totalorder %s273_s28, %s398_s1 }
  0x16   :  { %p279_p10 = pnand %p277_p9, %p274_p8 }
  0x18   :  { %282 = shalt.err (!%p279_p10)
}
  0x19   :  { %s283_s6 = scalar_lea.vmem %s351_s15, 2048  ;;  %p288_p12 = scmp.lt.s32.totalorder %s351_s15, %s351_s15 }
  0x1a   :  { %p284_p11 = scmp.ne.s32.totalorder %s351_s15, %s283_s6  ;;  %p289_p13 = scmp.lt.s32.totalorder %s283_s6, %s283_s6 }
  0x1c   :  { %p290_p0 = por %p289_p13, %p288_p12 }
  0x1e   :  { %p291_p1 = pnand %p290_p0, %p284_p11 }
  0x20   :  { %294 = shalt.err (!%p291_p1)
}
  0x21   :  { %s325_s0 = smov 128   ;;  %s326_s7 = smov 8  }
  0x22   :  { %32 = dma.hbm_to_vmem [thread:$0]  %s398_s1, 2048, %s351_s15, [#allocation7], %s325_s0, %s325_s0, %s326_s7  }
  0x23   :  { %317 = dma.done.wait [#allocation4], 128  }
  0x24   :  { %318 = vsyncadd [#allocation4], 4294967168 }
  0x25   :  { %319 = dma.done.wait [#allocation7], 2048  }
  0x26   :  { %320 = vsyncadd [#allocation7], 4294965248  ;;  %v327_v0 = vmov 0.0|0.0   ;;  %vm328_vm0 = vmmov 0   ;;  %v329_v1 = vmov 0.0   ;;  %v48_v2 = vld [vmem:[#allocation6] sm:$0xff] }
  0x27   :  { %219 = vmatprep.subr.bf16.mxu0 %v327_v0  ;;  %216 = vmatprep.mubr.msk.f32.mxu0 %vm328_vm0, %v329_v1  ;;  %v49_v3 = vld [vmem:[#allocation6 + $0x8] sm:$0xff]  ;;  %v50_v4 = vld [vmem:[#allocation6 + $0x10] sm:$0xff]  ;;  %v51_v6 = vld [vmem:[#allocation6 + $0x18] sm:$0xff]  ;;  %s330_s11 = smov [#allocation8]  }
  0x28   :  { %v220_v5 = vpack.c.bf16 %v49_v3, %v48_v2  ;;  %v223_v7 = vpack.c.bf16 %v51_v6, %v50_v4  ;;  %v52_v8 = vld [vmem:[#allocation6 + $0x20] sm:$0xff]  ;;  %v53_v9 = vld [vmem:[#allocation6 + $0x28] sm:$0xff]  ;;  %v54_v11 = vld [vmem:[#allocation6 + $0x30] sm:$0xff]  ;;  %s156_s12 = sshll.u32 %s330_s11, 4  ;;  %s157_s12 = int_to_ptr.vmem [resolvable:$true] %s156_s12 }
  0x29   :  { %v226_v10 = vpack.c.bf16 %v53_v9, %v52_v8  ;;  %v55_v12 = vld [vmem:[#allocation6 + $0x38] sm:$0xff]  ;;  %v56_v14 = vld [vmem:[#allocation6 + $0x40] sm:$0xff]  ;;  %v57_v15 = vld [vmem:[#allocation6 + $0x48] sm:$0xff]  ;;  %s295_s13 = scalar_lea.vmem %s157_s12, 128  ;;  %p300_p3 = scmp.lt.s32.totalorder %s157_s12, %s157_s12 }
  0x2a   :  { %221 = vmatpush3.bf16.msra.mxu0 %v220_v5  ;;  %v229_v13 = vpack.c.bf16 %v55_v12, %v54_v11  ;;  %v232_v16 = vpack.c.bf16 %v57_v15, %v56_v14  ;;  %v58_v17 = vld [vmem:[#allocation6 + $0x50] sm:$0xff]  ;;  %v59_v18 = vld [vmem:[#allocation6 + $0x58] sm:$0xff]  ;;  %v60_v20 = vld [vmem:[#allocation6 + $0x60] sm:$0xff]  ;;  %p296_p2 = scmp.ne.s32.totalorder %s157_s12, %s295_s13  ;;  %p301_p4 = scmp.lt.s32.totalorder %s295_s13, %s295_s13 }
  0x2b   :  { %222 = vmatprep.subr.bf16.mxu0 %v327_v0  ;;  %v235_v19 = vpack.c.bf16 %v59_v18, %v58_v17  ;;  %v61_v21 = vld [vmem:[#allocation6 + $0x68] sm:$0xff]  ;;  %v62_v23 = vld [vmem:[#allocation6 + $0x70] sm:$0xff]  ;;  %v63_v24 = vld [vmem:[#allocation6 + $0x78] sm:$0xff] }
  0x2c   :  { %v238_v22 = vpack.c.bf16 %v61_v21, %v60_v20  ;;  %v241_v25 = vpack.c.bf16 %v63_v24, %v62_v23  ;;  %v47_v26 = vld [vmem:[#allocation3] sm:$0xff]  ;;  %p302_p5 = por %p301_p4, %p300_p3 }
  0x2d   :  { %v166_v28 = vld [vmem:[%s399_s2] ss:$0 sm:$0xff] }
  0x2e   :  { %224 = vmatpush3.bf16.msra.mxu0 %v223_v7  ;;  %p303_p6 = pnand %p302_p5, %p296_p2 }
  0x2f   :  { %225 = vmatprep.subr.bf16.mxu0 %v327_v0 }
  0x32   :  { %227 = vmatpush3.bf16.msra.mxu0 %v226_v10 }
  0x33   :  { %228 = vmatprep.subr.bf16.mxu0 %v327_v0 }
  0x36   :  { %230 = vmatpush3.bf16.msra.mxu0 %v229_v13 }
  0x37   :  { %231 = vmatprep.subr.bf16.mxu0 %v327_v0 }
  0x3a   :  { %233 = vmatpush3.bf16.msra.mxu0 %v232_v16 }
  0x3b   :  { %234 = vmatprep.subr.bf16.mxu0 %v327_v0 }
  0x3e   :  { %236 = vmatpush3.bf16.msra.mxu0 %v235_v19 }
  0x3f   :  { %237 = vmatprep.subr.bf16.mxu0 %v327_v0 }
  0x42   :  { %239 = vmatpush3.bf16.msra.mxu0 %v238_v22 }
  0x43   :  { %240 = vmatprep.subr.bf16.mxu0 %v327_v0 }
  0x46   :  { %242 = vmatpush3.bf16.msra.mxu0 %v241_v25 }
  0x49   :  { %217 = vmatmul.mubr.f32.vlgmr.msra.gmra.mrb[0].mxu0 %v47_v26 }
 0x11c   :  { %v130_v27 = vpop.f32.mrb[0].mxu0 }
 0x11d   :  { %v140_v29 = vmul.f32 0.25, %v130_v27  ;;  %v218_v30 = vpop.f32.mrb[1].mxu0 }
 0x11f   :  { %v148_v31 = vadd.f32 %v166_v28, %v140_v29 }
 0x121   :  { %149 = vst [vmem:[#allocation8] sm:$0xff] %v148_v31 }
 0x122   :  { %306 = shalt.err (!%p303_p6)
}
 0x123   :  { %s307_s16 = scalar_lea.hbm %s400_s3, 128 }
 0x124   :  { %p308_p7 = scmp.ne.s32.totalorder %s400_s3, %s307_s16  ;;  %p311_p8 = scmp.lt.u32.totalorder %s307_s16, %s400_s3 }
 0x126   :  { %p313_p9 = pnand %p311_p8, %p308_p7 }
 0x128   :  { %316 = shalt.err (!%p313_p9)
}
 0x129   :  { %159 = dma.vmem_to_hbm [thread:$0]  %s157_s12, 128, %s400_s3, [#allocation5]  }
 0x12a   :  { %321 = dma.done.wait [#allocation5], 128  }
 0x12b   :  { %322 = vsyncadd [#allocation5], 4294967168 }
 0x12c   :  { %163 = vsyncpa [#allocation4], 1 }
 0x12d   :  { %164 = vsyncpa [#allocation7], 1 }
 0x12e   :  { %165 = vsyncpa [#allocation5], 1 }

</bundles_post_ra>
